<compile_context>
chip_gen: v7x
topology: tpu7x:2x2x1
jax: 0.10.0
libtpu: 0.0.40
codegen_flags: <defaults>
</compile_context>

<pallas_src>
import numpy as np
import jax
import jax.numpy as jnp
from jax import lax
from jax.experimental import pallas as pl
from jax.experimental.pallas import tpu as pltpu


_EPS = 1e-9  # torch.nn.CosineSimilarity default eps


def get_concat_index(batch_size):
    """Python port of InstanceContrastiveLoss.getConcatIndex."""
    res0, res1 = [], []
    for index in range(batch_size - 1):
        res0 += [index] * (batch_size - index - 1)
        res1 += list(range(index + 1, batch_size))
    return (np.asarray(res0, dtype=np.int32), np.asarray(res1, dtype=np.int32))


def _make_gram_cosine_kernel(precision):
    """Kernel: (TC, B, D) class block -> (TC, B, B) pairwise cosine sims."""

    def kernel(x_ref, o_ref):
        x = x_ref[...]                                    # (TC, B, D)
        xf = x if x.dtype == jnp.float32 else x.astype(jnp.float32)
        # Per-row squared norms (cheap; VPU/XLU), reused for every pair.
        n2 = jnp.sum(xf * xf, axis=-1)                    # (TC, B)
        # Per-class Gram matrix on the MXU with f32 accumulation.
        gram = jnp.einsum(
            "cid,cjd->cij", x, x,
            preferred_element_type=jnp.float32,
            precision=precision,
        )                                                 # (TC, B, B)
        # cos = dot / max(||a||*||b||, eps) == dot * rsqrt(max(n2_i*n2_j, eps^2))
        denom2 = jnp.maximum(
            n2[:, :, None] * n2[:, None, :], jnp.float32(_EPS * _EPS))
        o_ref[...] = (gram * lax.rsqrt(denom2)).astype(o_ref.dtype)

    return kernel


def instance_contrastive_distance(x, idx0, idx1, *, use_bf16=False,
                                  max_block_bytes=4 * 1024 * 1024):
    """x: (B, C, D); idx0/idx1: (P,) int32 pair indices -> (P, C) float32."""
    B, C, D = x.shape

    # Class-major layout (one XLA transpose; x is then read from HBM once by
    # the kernel pipeline).
    xc = jnp.transpose(x, (1, 0, 2))                      # (C, B, D)
    if use_bf16:
        # Optional: halve HBM/VMEM traffic and use the native bf16 MXU path
        # (v6e/v7x). Norms and accumulation stay in f32.
        xc = xc.astype(jnp.bfloat16)

    # Largest divisor of C whose (input + output) block fits the VMEM budget.
    bytes_per_class = B * D * xc.dtype.itemsize + B * B * 4
    tc_cap = max(1, max_block_bytes // max(bytes_per_class, 1))
    tc = 1
    for cand in range(1, C + 1):
        if C % cand == 0 and cand <= tc_cap:
            tc = cand
    grid = (C // tc,)

    # Full-f32 MXU contraction for f32 inputs so results match a pure-f32
    # reference; bf16 inputs use the native single-pass MXU path.
    precision = (lax.Precision.HIGHEST if xc.dtype == jnp.float32
                 else lax.Precision.DEFAULT)

    sims = pl.pallas_call(
        _make_gram_cosine_kernel(precision),
        out_shape=jax.ShapeDtypeStruct((C, B, B), jnp.float32),
        grid_spec=pltpu.PrefetchScalarGridSpec(
            num_scalar_prefetch=0,
            grid=grid,
            in_specs=[pl.BlockSpec((tc, B, D), lambda c: (c, 0, 0))],
            out_specs=pl.BlockSpec((tc, B, B), lambda c: (c, 0, 0)),
        ),
        compiler_params=pltpu.CompilerParams(
            dimension_semantics=("parallel",),
            vmem_limit_bytes=64 * 1024 * 1024,
        ),
    )(xc)                                                 # (C, B, B)

    # Static upper-triangle pair gather (tiny, done once by XLA).
    dist = sims[:, idx0, idx1]                            # (C, P)
    return jnp.transpose(dist, (1, 0))                    # (P, C)


class InstanceContrastiveLoss:
    """JAX/Pallas port of SPSL.InstanceContrastiveLoss (default reduce=None)."""

    def __init__(self, batch_size, reduce=None, size_average=None):
        self.batch_size = batch_size
        self.reduce = reduce
        self.size_average = size_average
        i0, i1 = get_concat_index(batch_size)
        self.idx0 = jnp.asarray(i0)
        self.idx1 = jnp.asarray(i1)

    def __call__(self, inp, target):
        # With reduce=None (the default), the PyTorch forward returns
        # `distance` and `target` does not influence the output.
        del target
        return instance_contrastive_distance(inp, self.idx0, self.idx1)


def _reference_distance(x, idx0, idx1, eps=_EPS):
    a = x[idx0]                                           # (P, C, D)
    b = x[idx1]                                           # (P, C, D)
    dot = jnp.sum(a * b, axis=-1)
    na = jnp.sqrt(jnp.sum(a * a, axis=-1))
    nb = jnp.sqrt(jnp.sum(b * b, axis=-1))
    return dot / jnp.maximum(na * nb, eps)


if __name__ == "__main__":
    B, C, D = 4, 8, 32   # BatchSize, classNum, featureDim
    key = jax.random.PRNGKey(0)
    kx, kt = jax.random.split(key)

    x = jax.random.normal(kx, (B, C, D), dtype=jnp.float32)
    # target in {-1, 0, 1}; unused on the reduce=None path but part of the API
    target = jax.random.randint(kt, (B, C), minval=-1, maxval=2).astype(jnp.float32)

    loss_mod = InstanceContrastiveLoss(batch_size=B)
    dist = loss_mod(x, target)
    dist = jax.block_until_ready(dist)

    ref = _reference_distance(x, loss_mod.idx0, loss_mod.idx1)
    assert dist.shape == (B * (B - 1) // 2, C), dist.shape
    assert np.allclose(np.asarray(dist), np.asarray(ref), atol=1e-4, rtol=1e-4), (
        "mismatch vs reference")

    print("KERNEL_OK")
</pallas_src>

<mosaic_0001>
module attributes {stable_mosaic.version = 11 : i64} {
  func.func @kernel(%arg0: i32, %arg1: memref<8x4x32xf32, #tpu.memory_space<vmem>>, %arg2: memref<8x4x4xf32, #tpu.memory_space<vmem>>) attributes {dimension_semantics = [#tpu.dimension_semantics<parallel>], iteration_bounds = array<i64: 1>, scalar_prefetch = 0 : i64, scratch_operands = 0 : i64, tpu.core_type = #tpu.core_type<tc>, window_params = [{transform_indices = @transform_0, window_bounds = array<i64: 8, 4, 32>}, {transform_indices = @transform_1, window_bounds = array<i64: 8, 4, 4>}]} {
    %c0 = arith.constant 0 : index
    %c0_0 = arith.constant 0 : index
    %c0_1 = arith.constant 0 : index
    %0 = vector.load %arg1[%c0, %c0_0, %c0_1] : memref<8x4x32xf32, #tpu.memory_space<vmem>>, vector<8x4x32xf32>
    %1 = arith.mulf %0, %0 : vector<8x4x32xf32>
    %cst = arith.constant dense<0.000000e+00> : vector<8x4xf32>
    %2 = vector.multi_reduction <add>, %1, %cst [2] : vector<8x4x32xf32> to vector<8x4xf32>
    "tpu.trace_start"() <{level = 10 : i32, message = "cid,cjd->cij"}> : () -> ()
    %cst_2 = arith.constant dense<0.000000e+00> : vector<8x4x4xf32>
    %3 = tpu.matmul %0, %0, %cst_2 {dimension_numbers = #tpu.dot_dimension_numbers<[2], [2], [1], [1], [0, 0, 0, 1, 1, 1], [0], [0]>, precision = #tpu.contract_precision<fp32>} : vector<8x4x32xf32>, vector<8x4x32xf32>, vector<8x4x4xf32> -> vector<8x4x4xf32>
    "tpu.trace_stop"() : () -> ()
    %4 = vector.shape_cast %2 : vector<8x4xf32> to vector<8x4x1xf32>
    %5 = vector.shape_cast %2 : vector<8x4xf32> to vector<8x1x4xf32>
    %6 = vector.broadcast %4 : vector<8x4x1xf32> to vector<8x4x4xf32>
    %7 = vector.broadcast %5 : vector<8x1x4xf32> to vector<8x4x4xf32>
    %8 = arith.mulf %6, %7 : vector<8x4x4xf32>
    %cst_3 = arith.constant 1.000000e-18 : f32
    %9 = vector.broadcast %cst_3 : f32 to vector<8x4x4xf32>
    %10 = arith.maximumf %8, %9 : vector<8x4x4xf32>
    %11 = math.rsqrt %10 : vector<8x4x4xf32>
    %12 = arith.mulf %3, %11 : vector<8x4x4xf32>
    %c0_4 = arith.constant 0 : index
    %c0_5 = arith.constant 0 : index
    %c0_6 = arith.constant 0 : index
    %13 = vector.load %arg2[%c0_4, %c0_5, %c0_6] : memref<8x4x4xf32, #tpu.memory_space<vmem>>, vector<8x4x4xf32>
    tpu.vector_store %arg2[%c0_4, %c0_5, %c0_6], %12 {strides = array<i32>} : memref<8x4x4xf32, #tpu.memory_space<vmem>>, vector<8x4x4xf32>,
    return
  }
  func.func @transform_0(%arg0: i32) -> (i32, i32, i32) {
    %c0_i32 = arith.constant 0 : i32
    %c0_i32_0 = arith.constant 0 : i32
    %c0_i32_1 = arith.constant 0 : i32
    return %arg0, %c0_i32, %c0_i32_0 : i32, i32, i32
  }
  func.func @transform_1(%arg0: i32) -> (i32, i32, i32) {
    %c0_i32 = arith.constant 0 : i32
    %c0_i32_0 = arith.constant 0 : i32
    %c0_i32_1 = arith.constant 0 : i32
    return %arg0, %c0_i32, %c0_i32_0 : i32, i32, i32
  }
}

</mosaic_0001>

<bundles_post_ra>
// kernel: tpu_custom_call.1
= control target key start
LH: loop header
LB: loop body
LE: loop exit
PB: predicated region body
PF: predicated region fallthrough
CT: control target
= control target key end

     0   :  { %6 = vsyncpa [#allocation3], 0  ;;  %s4593_s0 = inlined_call_operand.hbm [shape: f32[8,4,32], index: 0, kind: input, shape index: {}]   ;;  %s4594_s1 = inlined_call_operand.hbm [shape: f32[8,4,4], index: 1, kind: output, shape index: {}]  }
   0x1   :  { %7 = vsyncpa [#allocation4], 0  ;;  %s4269_s6 = smov [#allocation2]   ;;  %s4221_s10 = scalar_lea.hbm %s4593_s0, 512 }
   0x2   :  { %s13_s7 = sshll.u32 %s4269_s6, 4  ;;  %p4222_p0 = scmp.ne.s32.totalorder %s4593_s0, %s4221_s10  ;;  %s14_s7 = int_to_ptr.vmem [resolvable:$true] %s13_s7 }
   0x3   :  { %p4225_p1 = scmp.lt.u32.totalorder %s4221_s10, %s4593_s0 }
   0x5   :  { %p4227_p2 = pnand %p4225_p1, %p4222_p0 }
   0x7   :  { %4230 = shalt.err (!%p4227_p2)
}
   0x8   :  { %s4231_s15 = scalar_lea.vmem %s14_s7, 512  ;;  %p4236_p4 = scmp.lt.s32.totalorder %s14_s7, %s14_s7 }
   0x9   :  { %p4232_p3 = scmp.ne.s32.totalorder %s14_s7, %s4231_s15  ;;  %p4237_p5 = scmp.lt.s32.totalorder %s4231_s15, %s4231_s15 }
   0xb   :  { %p4238_p6 = por %p4237_p5, %p4236_p4 }
   0xd   :  { %p4239_p7 = pnand %p4238_p6, %p4232_p3 }
   0xf   :  { %4242 = shalt.err (!%p4239_p7)
}
  0x10   :  { %s4270_s16 = smov 64   ;;  %s4271_s17 = smov 4  }
  0x11   :  { %19 = dma.hbm_to_vmem [thread:$0]  %s4593_s0, 512, %s14_s7, [#allocation3], %s4270_s16, %s4270_s16, %s4271_s17  }
  0x12   :  { %4265 = dma.done.wait [#allocation3], 512  }
  0x13   :  { %4266 = vsyncadd [#allocation3], 4294966784  ;;  %v4272_v0 = vmov 0.0   ;;  %vm4273_vm0 = vmmov 0   ;;  %vm64_vm1 = vcmask 261120   ;;  %vm39_vm2 = vcmask 257024  }
  0x14   :  { %3879 = vmatprep.subr.mxu0 %v4272_v0  ;;  %3909 = vmatprep.subr.mxu1 %v4272_v0  ;;  %v23_v1 = vld [vmem:[#allocation2] sm:$0xf]  ;;  %v24_v2 = vld [vmem:[#allocation2 + $0x4] sm:$0xf]  ;;  %v4317_v12 = vld [vmem:[#allocation2 + $0x18] sm:$0xf] }
  0x15   :  { %3881 = vmatprep.mubr.msk.f32.mxu0 %vm4273_vm0, %v4272_v0  ;;  %3911 = vmatprep.mubr.msk.f32.mxu1 %vm4273_vm0, %v4272_v0  ;;  %v66_v3 = vsel %vm64_vm1, %v23_v1, 0  ;;  %v515_v4 = vsel %vm64_vm1, %v24_v2, 0  ;;  %v31_v5 = vmul.f32 %v23_v1, %v23_v1  ;;  %v32_v9 = vmul.f32 %v24_v2, %v24_v2  ;;  %v4319_v13 = vld [vmem:[#allocation2 + $0x1c] sm:$0xf]  ;;  %v25_v23 = vld [vmem:[#allocation2 + $0x8] sm:$0xf] }
  0x16   :  { %v4308_v6 = vand.u32 4294901760, %v66_v3  ;;  %v4310_v7 = vand.u32 4294901760, %v515_v4  ;;  %v4325_v14 = vsel %vm64_vm1, %v4317_v12, 0  ;;  %v4330_v18 = vsel %vm64_vm1, %v4319_v13, 0  ;;  %v26_v25 = vld [vmem:[#allocation2 + $0xc] sm:$0xf] }
  0x17   :  { %v40_v8 = vsel %vm39_vm2, %v31_v5, 0.0  ;;  %v43_v17 = vsel %vm39_vm2, %v32_v9, 0.0  ;;  %v33_v24 = vmul.f32 %v25_v23, %v25_v23  ;;  %v34_v27 = vmul.f32 %v26_v25, %v26_v25  ;;  %v27_v41 = vld [vmem:[#allocation2 + $0x10] sm:$0xf]  ;;  %v28_v42 = vld [vmem:[#allocation2 + $0x14] sm:$0xf] }
  0x18   :  { %3880 = vmatpush3.xpose.msra.mxu0 %v4308_v6  ;;  %3910 = vmatpush3.xpose.msra.mxu1 %v4310_v7  ;;  %v135_v10 = vsub.f32 %v66_v3, %v4308_v6  ;;  %v584_v11 = vsub.f32 %v515_v4, %v4310_v7  ;;  %v964_v29 = vsel %vm64_vm1, %v25_v23, 0  ;;  %v1413_v30 = vsel %vm64_vm1, %v26_v25, 0  ;;  %s4274_s0 = smov [#allocation5]  }
  0x19   :  { %3884 = vmatprep.subr.mxu0 %v4272_v0  ;;  %3914 = vmatprep.subr.mxu1 %v4272_v0  ;;  %v46_v26 = vsel %vm39_vm2, %v33_v24, 0.0  ;;  %v49_v28 = vsel %vm39_vm2, %v34_v27, 0.0  ;;  %v4358_v31 = vand.u32 4294901760, %v964_v29  ;;  %v4360_v32 = vand.u32 4294901760, %v1413_v30  ;;  %s3771_s20 = sshll.u32 %s4274_s0, 4  ;;  %s3772_s20 = int_to_ptr.vmem [resolvable:$true] %s3771_s20 }
  0x1a   :  { %v136_v15 = vand.u32 4294901760, %v135_v10  ;;  %v585_v16 = vand.u32 4294901760, %v584_v11  ;;  %41 = vadd.xlane.f32.xlu0 %v40_v8  ;;  %47 = vadd.xlane.f32.xlu1 %v46_v26  ;;  %v36_v43 = vmul.f32 %v28_v42, %v28_v42  ;;  %v35_v44 = vmul.f32 %v27_v41, %v27_v41  ;;  %s4243_s21 = scalar_lea.vmem %s3772_s20, 512  ;;  %p4248_p9 = scmp.lt.s32.totalorder %s3772_s20, %s3772_s20 }
  0x1b   :  { %v1033_v33 = vsub.f32 %v964_v29, %v4358_v31  ;;  %v1482_v34 = vsub.f32 %v1413_v30, %v4360_v32  ;;  %v38_v47 = vmul.f32 %v4319_v13, %v4319_v13  ;;  %v37_v48 = vmul.f32 %v4317_v12, %v4317_v12  ;;  %p4244_p8 = scmp.ne.s32.totalorder %s3772_s20, %s4243_s21  ;;  %p4249_p10 = scmp.lt.s32.totalorder %s4243_s21, %s4243_s21 }
  0x1c   :  { %v137_v19 = vsub.f32 %v135_v10, %v136_v15  ;;  %v586_v20 = vsub.f32 %v584_v11, %v585_v16  ;;  %v55_v45 = vsel %vm39_vm2, %v36_v43, 0.0  ;;  %v52_v46 = vsel %vm39_vm2, %v35_v44, 0.0 }
  0x1d   :  { %v4372_v35 = vand.u32 4294901760, %v1033_v33  ;;  %v4374_v36 = vand.u32 4294901760, %v1482_v34  ;;  %v61_v49 = vsel %vm39_vm2, %v38_v47, 0.0  ;;  %v58_v50 = vsel %vm39_vm2, %v37_v48, 0.0  ;;  %p4250_p11 = por %p4249_p10, %p4248_p9 }
  0x1e   :  { %v138_v21 = vand.u32 4294901760, %v137_v19  ;;  %v587_v22 = vand.u32 4294901760, %v586_v20  ;;  %44 = vadd.xlane.f32.xlu0 %v43_v17  ;;  %50 = vadd.xlane.f32.xlu1 %v49_v28  ;;  %v1862_v51 = vsel %vm64_vm1, %v27_v41, 0  ;;  %v2311_v52 = vsel %vm64_vm1, %v28_v42, 0 }
  0x1f   :  { %v1035_v37 = vsub.f32 %v1033_v33, %v4372_v35  ;;  %v1484_v38 = vsub.f32 %v1482_v34, %v4374_v36  ;;  %v4430_v53 = vand.u32 4294901760, %v1862_v51  ;;  %v4432_v54 = vand.u32 4294901760, %v2311_v52  ;;  %p4251_p12 = pnand %p4250_p11, %p4244_p8 }
  0x20   :  { %3882 = vmatmul.mubr.f32.vlgmr.msra.gmra.mrb[0].mxu0 %v138_v21  ;;  %3912 = vmatmul.mubr.f32.vlgmr.msra.gmra.mrb[0].mxu1 %v587_v22  ;;  %v4487_v63 = vand.u32 4294901760, %v4325_v14  ;;  %v4490_v1 = vand.u32 4294901760, %v4330_v18  ;;  %vm3757_vm3 = vcmask 27648  }
  0x21   :  { %3885 = vmatpush3.xpose.msra.mxu0 %v138_v21  ;;  %3915 = vmatpush3.xpose.msra.mxu1 %v587_v22  ;;  %v1036_v39 = vand.u32 4294901760, %v1035_v37  ;;  %v1485_v40 = vand.u32 4294901760, %v1484_v38  ;;  %v1931_v55 = vsub.f32 %v1862_v51, %v4430_v53  ;;  %v2380_v56 = vsub.f32 %v2311_v52, %v4432_v54 }
  0x22   :  { %3886 = vmatprep.mubr.msk.f32.mxu0 %vm4273_vm0, %v4272_v0  ;;  %3889 = vmatprep.subr.mxu0 %v4272_v0  ;;  %v2829_v2 = vsub.f32 %v4325_v14, %v4487_v63  ;;  %v3278_v3 = vsub.f32 %v4330_v18, %v4490_v1 }
  0x23   :  { %3916 = vmatprep.mubr.msk.f32.mxu1 %vm4273_vm0, %v4272_v0  ;;  %3919 = vmatprep.subr.mxu1 %v4272_v0  ;;  %v1932_v57 = vand.u32 4294901760, %v1931_v55  ;;  %v2381_v58 = vand.u32 4294901760, %v2380_v56 }
  0x24   :  { %56 = vadd.xlane.f32.xlu1 %v55_v45  ;;  %53 = vadd.xlane.f32.xlu0 %v52_v46  ;;  %v2830_v4 = vand.u32 4294901760, %v2829_v2  ;;  %v3279_v5 = vand.u32 4294901760, %v3278_v3 }
  0x25   :  { %v1933_v59 = vsub.f32 %v1931_v55, %v1932_v57  ;;  %v2382_v60 = vsub.f32 %v2380_v56, %v2381_v58 }
  0x27   :  { %v1934_v61 = vand.u32 4294901760, %v1933_v59  ;;  %v2383_v62 = vand.u32 4294901760, %v2382_v60 }
  0x28   :  { %3887 = vmatmul.mubr.f32.vlgmr.msra.gmra.mrb[0].mxu0 %v4308_v6  ;;  %3917 = vmatmul.mubr.f32.vlgmr.msra.gmra.mrb[0].mxu1 %v4310_v7 }
  0x29   :  { %3890 = vmatpush3.xpose.msra.mxu0 %v135_v10  ;;  %3920 = vmatpush3.xpose.msra.mxu1 %v584_v11 }
  0x2a   :  { %3891 = vmatprep.mubr.msk.f32.mxu0 %vm4273_vm0, %v4272_v0  ;;  %3894 = vmatprep.subr.mxu0 %v4272_v0 }
  0x2b   :  { %3921 = vmatprep.mubr.msk.f32.mxu1 %vm4273_vm0, %v4272_v0  ;;  %3924 = vmatprep.subr.mxu1 %v4272_v0 }
  0x2c   :  { %62 = vadd.xlane.f32.xlu1 %v61_v49  ;;  %59 = vadd.xlane.f32.xlu0 %v58_v50 }
  0x30   :  { %3892 = vmatmul.mubr.f32.vlgmr.msra.gmra.mrb[0].mxu0 %v135_v10  ;;  %3922 = vmatmul.mubr.f32.vlgmr.msra.gmra.mrb[0].mxu1 %v584_v11  ;;  %v3665_v10 = vlaneseq }
  0x31   :  { %3895 = vmatpush3.xpose.msra.mxu0 %v4308_v6  ;;  %3925 = vmatpush3.xpose.msra.mxu1 %v4310_v7 }
  0x32   :  { %3896 = vmatprep.mubr.msk.f32.mxu0 %vm4273_vm0, %v4272_v0  ;;  %3899 = vmatprep.subr.mxu0 %v4272_v0  ;;  %v3666_v11 = vand.u32 127, %v3665_v10  ;;  %v3668_v12 = vshrl.u32 %v3665_v10, 7 }
  0x33   :  { %3926 = vmatprep.mubr.msk.f32.mxu1 %vm4273_vm0, %v4272_v0  ;;  %3929 = vmatprep.subr.mxu1 %v4272_v0 }
  0x34   :  { %v4560_v14 = vsub.s32 %v3666_v11, %v3668_v12 }
  0x38   :  { %3897 = vmatmul.mubr.f32.vlgmr.msra.gmra.mrb[0].mxu0 %v136_v15  ;;  %3927 = vmatmul.mubr.f32.vlgmr.msra.gmra.mrb[0].mxu1 %v585_v16 }
  0x39   :  { %3900 = vmatpush3.xpose.msra.mxu0 %v136_v15  ;;  %3930 = vmatpush3.xpose.msra.mxu1 %v585_v16 }
  0x3a   :  { %3901 = vmatprep.mubr.msk.f32.mxu0 %vm4273_vm0, %v4272_v0  ;;  %3904 = vmatprep.subr.mxu0 %v4272_v0 }
  0x3b   :  { %3931 = vmatprep.mubr.msk.f32.mxu1 %vm4273_vm0, %v4272_v0  ;;  %3934 = vmatprep.subr.mxu1 %v4272_v0 }
  0x40   :  { %3902 = vmatmul.mubr.f32.vlgmr.msra.gmra.mrb[0].mxu0 %v4308_v6  ;;  %3932 = vmatmul.mubr.f32.vlgmr.msra.gmra.mrb[0].mxu1 %v4310_v7 }
  0x41   :  { %3905 = vmatpush3.xpose.msra.mxu0 %v4308_v6  ;;  %3935 = vmatpush3.xpose.msra.mxu1 %v4310_v7 }
  0x42   :  { %3906 = vmatprep.mubr.msk.f32.mxu0 %vm4273_vm0, %v4272_v0  ;;  %3936 = vmatprep.mubr.msk.f32.mxu1 %vm4273_vm0, %v4272_v0 }
  0x43   :  { %3939 = vmatprep.subr.mxu0 %v4272_v0  ;;  %3969 = vmatprep.subr.mxu1 %v4272_v0 }
  0x48   :  { %3907 = vmatmul.mubr.f32.vlgmr.msra.gmra.mrb[0].mxu0 %v4308_v6  ;;  %3937 = vmatmul.mubr.f32.vlgmr.msra.gmra.mrb[0].mxu1 %v4310_v7  ;;  %v2831_v6 = vsub.f32 %v2829_v2, %v2830_v4  ;;  %v3280_v7 = vsub.f32 %v3278_v3, %v3279_v5 }
  0x49   :  { %3940 = vmatpush3.xpose.msra.mxu0 %v4358_v31  ;;  %3970 = vmatpush3.xpose.msra.mxu1 %v4360_v32 }
  0x4a   :  { %3941 = vmatprep.mubr.msk.f32.mxu0 %vm4273_vm0, %v4272_v0  ;;  %3944 = vmatprep.subr.mxu0 %v4272_v0  ;;  %v2832_v8 = vand.u32 4294901760, %v2831_v6  ;;  %v3281_v9 = vand.u32 4294901760, %v3280_v7 }
  0x4b   :  { %3971 = vmatprep.mubr.msk.f32.mxu1 %vm4273_vm0, %v4272_v0  ;;  %3974 = vmatprep.subr.mxu1 %v4272_v0 }
  0x4c   :  { %3942 = vmatmul.mubr.f32.vlgmr.msra.gmra.mrb[2].mxu0 %v1036_v39  ;;  %3972 = vmatmul.mubr.f32.vlgmr.msra.gmra.mrb[2].mxu1 %v1485_v40 }
  0x4d   :  { %3945 = vmatpush3.xpose.msra.mxu0 %v1036_v39  ;;  %3975 = vmatpush3.xpose.msra.mxu1 %v1485_v40 }
  0x4e   :  { %3946 = vmatprep.mubr.msk.f32.mxu0 %vm4273_vm0, %v4272_v0  ;;  %3949 = vmatprep.subr.mxu0 %v4272_v0 }
  0x4f   :  { %3976 = vmatprep.mubr.msk.f32.mxu1 %vm4273_vm0, %v4272_v0  ;;  %3979 = vmatprep.subr.mxu1 %v4272_v0 }
  0x54   :  { %3947 = vmatmul.mubr.f32.vlgmr.msra.gmra.mrb[2].mxu0 %v4358_v31  ;;  %3977 = vmatmul.mubr.f32.vlgmr.msra.gmra.mrb[2].mxu1 %v4360_v32 }
  0x55   :  { %3950 = vmatpush3.xpose.msra.mxu0 %v1033_v33  ;;  %3980 = vmatpush3.xpose.msra.mxu1 %v1482_v34 }
  0x56   :  { %3951 = vmatprep.mubr.msk.f32.mxu0 %vm4273_vm0, %v4272_v0  ;;  %3954 = vmatprep.subr.mxu0 %v4272_v0 }
  0x57   :  { %3981 = vmatprep.mubr.msk.f32.mxu1 %vm4273_vm0, %v4272_v0  ;;  %3984 = vmatprep.subr.mxu1 %v4272_v0 }
  0x5c   :  { %3952 = vmatmul.mubr.f32.vlgmr.msra.gmra.mrb[2].mxu0 %v1033_v33  ;;  %3982 = vmatmul.mubr.f32.vlgmr.msra.gmra.mrb[2].mxu1 %v1482_v34 }
  0x5d   :  { %3955 = vmatpush3.xpose.msra.mxu0 %v4358_v31  ;;  %3985 = vmatpush3.xpose.msra.mxu1 %v4360_v32 }
  0x5e   :  { %3956 = vmatprep.mubr.msk.f32.mxu0 %vm4273_vm0, %v4272_v0  ;;  %3959 = vmatprep.subr.mxu0 %v4272_v0 }
  0x5f   :  { %3986 = vmatprep.mubr.msk.f32.mxu1 %vm4273_vm0, %v4272_v0  ;;  %3989 = vmatprep.subr.mxu1 %v4272_v0 }
  0x64   :  { %3957 = vmatmul.mubr.f32.vlgmr.msra.gmra.mrb[2].mxu0 %v4372_v35  ;;  %3987 = vmatmul.mubr.f32.vlgmr.msra.gmra.mrb[2].mxu1 %v4374_v36 }
  0x65   :  { %3960 = vmatpush3.xpose.msra.mxu0 %v4372_v35  ;;  %3990 = vmatpush3.xpose.msra.mxu1 %v4374_v36 }
  0x66   :  { %3961 = vmatprep.mubr.msk.f32.mxu0 %vm4273_vm0, %v4272_v0  ;;  %3964 = vmatprep.subr.mxu0 %v4272_v0 }
  0x67   :  { %3991 = vmatprep.mubr.msk.f32.mxu1 %vm4273_vm0, %v4272_v0  ;;  %3994 = vmatprep.subr.mxu1 %v4272_v0 }
  0x6c   :  { %3962 = vmatmul.mubr.f32.vlgmr.msra.gmra.mrb[2].mxu0 %v4358_v31  ;;  %3992 = vmatmul.mubr.f32.vlgmr.msra.gmra.mrb[2].mxu1 %v4360_v32 }
  0x6d   :  { %3965 = vmatpush3.xpose.msra.mxu0 %v4358_v31  ;;  %3995 = vmatpush3.xpose.msra.mxu1 %v4360_v32 }
  0x6e   :  { %3966 = vmatprep.mubr.msk.f32.mxu0 %vm4273_vm0, %v4272_v0  ;;  %3996 = vmatprep.mubr.msk.f32.mxu1 %vm4273_vm0, %v4272_v0 }
  0x6f   :  { %3999 = vmatprep.subr.mxu0 %v4272_v0  ;;  %4029 = vmatprep.subr.mxu1 %v4272_v0 }
  0x74   :  { %3967 = vmatmul.mubr.f32.vlgmr.msra.gmra.mrb[2].mxu0 %v4358_v31  ;;  %3997 = vmatmul.mubr.f32.vlgmr.msra.gmra.mrb[2].mxu1 %v4360_v32 }
  0x75   :  { %4000 = vmatpush3.xpose.msra.mxu0 %v4430_v53  ;;  %4030 = vmatpush3.xpose.msra.mxu1 %v4432_v54 }
  0x76   :  { %4001 = vmatprep.mubr.msk.f32.mxu0 %vm4273_vm0, %v4272_v0  ;;  %4004 = vmatprep.subr.mxu0 %v4272_v0 }
  0x77   :  { %4031 = vmatprep.mubr.msk.f32.mxu1 %vm4273_vm0, %v4272_v0  ;;  %4034 = vmatprep.subr.mxu1 %v4272_v0 }
  0x78   :  { %4002 = vmatmul.mubr.f32.vlgmr.msra.gmra.mrb[4].mxu0 %v1934_v61  ;;  %4032 = vmatmul.mubr.f32.vlgmr.msra.gmra.mrb[4].mxu1 %v2383_v62 }
  0x79   :  { %4005 = vmatpush3.xpose.msra.mxu0 %v1934_v61  ;;  %4035 = vmatpush3.xpose.msra.mxu1 %v2383_v62 }
  0x7a   :  { %4006 = vmatprep.mubr.msk.f32.mxu0 %vm4273_vm0, %v4272_v0  ;;  %4009 = vmatprep.subr.mxu0 %v4272_v0 }
  0x7b   :  { %4036 = vmatprep.mubr.msk.f32.mxu1 %vm4273_vm0, %v4272_v0  ;;  %4039 = vmatprep.subr.mxu1 %v4272_v0 }
  0x80   :  { %4007 = vmatmul.mubr.f32.vlgmr.msra.gmra.mrb[4].mxu0 %v4430_v53  ;;  %4037 = vmatmul.mubr.f32.vlgmr.msra.gmra.mrb[4].mxu1 %v4432_v54 }
  0x81   :  { %4010 = vmatpush3.xpose.msra.mxu0 %v1931_v55  ;;  %4040 = vmatpush3.xpose.msra.mxu1 %v2380_v56 }
  0x82   :  { %4011 = vmatprep.mubr.msk.f32.mxu0 %vm4273_vm0, %v4272_v0  ;;  %4014 = vmatprep.subr.mxu0 %v4272_v0 }
  0x83   :  { %4041 = vmatprep.mubr.msk.f32.mxu1 %vm4273_vm0, %v4272_v0  ;;  %4044 = vmatprep.subr.mxu1 %v4272_v0 }
  0x88   :  { %4012 = vmatmul.mubr.f32.vlgmr.msra.gmra.mrb[4].mxu0 %v1931_v55  ;;  %4042 = vmatmul.mubr.f32.vlgmr.msra.gmra.mrb[4].mxu1 %v2380_v56 }
  0x89   :  { %4015 = vmatpush3.xpose.msra.mxu0 %v4430_v53  ;;  %4045 = vmatpush3.xpose.msra.mxu1 %v4432_v54 }
  0x8a   :  { %4016 = vmatprep.mubr.msk.f32.mxu0 %vm4273_vm0, %v4272_v0  ;;  %4019 = vmatprep.subr.mxu0 %v4272_v0 }
  0x8b   :  { %4046 = vmatprep.mubr.msk.f32.mxu1 %vm4273_vm0, %v4272_v0  ;;  %4049 = vmatprep.subr.mxu1 %v4272_v0 }
  0x90   :  { %4017 = vmatmul.mubr.f32.vlgmr.msra.gmra.mrb[4].mxu0 %v1932_v57  ;;  %4047 = vmatmul.mubr.f32.vlgmr.msra.gmra.mrb[4].mxu1 %v2381_v58 }
  0x91   :  { %4020 = vmatpush3.xpose.msra.mxu0 %v1932_v57  ;;  %4050 = vmatpush3.xpose.msra.mxu1 %v2381_v58 }
  0x92   :  { %4021 = vmatprep.mubr.msk.f32.mxu0 %vm4273_vm0, %v4272_v0  ;;  %4024 = vmatprep.subr.mxu0 %v4272_v0 }
  0x93   :  { %4051 = vmatprep.mubr.msk.f32.mxu1 %vm4273_vm0, %v4272_v0  ;;  %4054 = vmatprep.subr.mxu1 %v4272_v0 }
  0x98   :  { %4022 = vmatmul.mubr.f32.vlgmr.msra.gmra.mrb[4].mxu0 %v4430_v53  ;;  %4052 = vmatmul.mubr.f32.vlgmr.msra.gmra.mrb[4].mxu1 %v4432_v54 }
  0x99   :  { %4025 = vmatpush3.xpose.msra.mxu0 %v4430_v53  ;;  %4055 = vmatpush3.xpose.msra.mxu1 %v4432_v54 }
  0x9a   :  { %4026 = vmatprep.mubr.msk.f32.mxu0 %vm4273_vm0, %v4272_v0  ;;  %4056 = vmatprep.mubr.msk.f32.mxu1 %vm4273_vm0, %v4272_v0 }
  0x9b   :  { %4059 = vmatprep.subr.mxu0 %v4272_v0  ;;  %4089 = vmatprep.subr.mxu1 %v4272_v0 }
  0xa0   :  { %4027 = vmatmul.mubr.f32.vlgmr.msra.gmra.mrb[4].mxu0 %v4430_v53  ;;  %4057 = vmatmul.mubr.f32.vlgmr.msra.gmra.mrb[4].mxu1 %v4432_v54 }
  0xa1   :  { %4060 = vmatpush3.xpose.msra.mxu0 %v4487_v63  ;;  %4090 = vmatpush3.xpose.msra.mxu1 %v4490_v1 }
  0xa2   :  { %4061 = vmatprep.mubr.msk.f32.mxu0 %vm4273_vm0, %v4272_v0  ;;  %4064 = vmatprep.subr.mxu0 %v4272_v0 }
  0xa3   :  { %4091 = vmatprep.mubr.msk.f32.mxu1 %vm4273_vm0, %v4272_v0  ;;  %4094 = vmatprep.subr.mxu1 %v4272_v0 }
  0xa4   :  { %4062 = vmatmul.mubr.f32.vlgmr.msra.gmra.mrb[6].mxu0 %v2832_v8  ;;  %4092 = vmatmul.mubr.f32.vlgmr.msra.gmra.mrb[6].mxu1 %v3281_v9 }
  0xa5   :  { %4065 = vmatpush3.xpose.msra.mxu0 %v2832_v8  ;;  %4095 = vmatpush3.xpose.msra.mxu1 %v3281_v9 }
  0xa6   :  { %4066 = vmatprep.mubr.msk.f32.mxu0 %vm4273_vm0, %v4272_v0  ;;  %4069 = vmatprep.subr.mxu0 %v4272_v0 }
  0xa7   :  { %4096 = vmatprep.mubr.msk.f32.mxu1 %vm4273_vm0, %v4272_v0  ;;  %4099 = vmatprep.subr.mxu1 %v4272_v0  ;;  %v42_v13 = vpop.xlane.xlu0 %41  ;;  %v48_v29 = vpop.xlane.xlu1 %47 }
  0xa8   :  { %v3670_v16 = vrot.slane %v42_v13, %v4560_v14  ;;  %v3678_v31 = vrot.slane %v48_v29, %v4560_v14 }
  0xaa   :  { %v3725_v18 = vmul.f32 %v3670_v16, %v42_v13  ;;  %v3727_v33 = vmul.f32 %v3678_v31, %v48_v29 }
  0xab   :  { %v45_v15 = vpop.xlane.xlu0 %44  ;;  %v51_v30 = vpop.xlane.xlu1 %50 }
  0xac   :  { %4067 = vmatmul.mubr.f32.vlgmr.msra.gmra.mrb[6].mxu0 %v4487_v63  ;;  %4097 = vmatmul.mubr.f32.vlgmr.msra.gmra.mrb[6].mxu1 %v4490_v1  ;;  %v3674_v17 = vrot.slane %v45_v15, %v4560_v14  ;;  %v3733_v20 = vmax.f32 %v3725_v18, 1e-18  ;;  %v3682_v32 = vrot.slane %v51_v30, %v4560_v14  ;;  %v3735_v35 = vmax.f32 %v3727_v33, 1e-18 }
  0xad   :  { %4070 = vmatpush3.xpose.msra.mxu0 %v2829_v2  ;;  %4100 = vmatpush3.xpose.msra.mxu1 %v3278_v3 }
  0xae   :  { %4071 = vmatprep.mubr.msk.f32.mxu0 %vm4273_vm0, %v4272_v0  ;;  %4074 = vmatprep.subr.mxu0 %v4272_v0  ;;  %v3726_v19 = vmul.f32 %v3674_v17, %v45_v15  ;;  %4205 = vrsqrt.f32 %v3733_v20  ;;  %v3728_v34 = vmul.f32 %v3682_v32, %v51_v30 }
  0xaf   :  { %4101 = vmatprep.mubr.msk.f32.mxu1 %vm4273_vm0, %v4272_v0  ;;  %4104 = vmatprep.subr.mxu1 %v4272_v0 }
  0xb0   :  { %v3734_v21 = vmax.f32 %v3726_v19, 1e-18  ;;  %v3736_v36 = vmax.f32 %v3728_v34, 1e-18 }
  0xb1   :  { %v57_v45 = vpop.xlane.xlu1 %56  ;;  %v54_v46 = vpop.xlane.xlu0 %53 }
  0xb2   :  { %4207 = vrsqrt.f32 %v3734_v21  ;;  %v3690_v47 = vrot.slane %v57_v45, %v4560_v14  ;;  %v3686_v48 = vrot.slane %v54_v46, %v4560_v14 }
  0xb3   :  { %4209 = vrsqrt.f32 %v3735_v35 }
  0xb4   :  { %4072 = vmatmul.mubr.f32.vlgmr.msra.gmra.mrb[6].mxu0 %v2829_v2  ;;  %4102 = vmatmul.mubr.f32.vlgmr.msra.gmra.mrb[6].mxu1 %v3278_v3  ;;  %4211 = vrsqrt.f32 %v3736_v36  ;;  %v3730_v49 = vmul.f32 %v3690_v47, %v57_v45  ;;  %v3729_v50 = vmul.f32 %v3686_v48, %v54_v46 }
  0xb5   :  { %4075 = vmatpush3.xpose.msra.mxu0 %v4487_v63  ;;  %4105 = vmatpush3.xpose.msra.mxu1 %v4490_v1 }
  0xb6   :  { %4076 = vmatprep.mubr.msk.f32.mxu0 %vm4273_vm0, %v4272_v0  ;;  %4079 = vmatprep.subr.mxu0 %v4272_v0  ;;  %v3738_v51 = vmax.f32 %v3730_v49, 1e-18  ;;  %v3737_v52 = vmax.f32 %v3729_v50, 1e-18 }
  0xb7   :  { %4106 = vmatprep.mubr.msk.f32.mxu1 %vm4273_vm0, %v4272_v0  ;;  %4109 = vmatprep.subr.mxu1 %v4272_v0 }
  0xb8   :  { %4213 = vrsqrt.f32 %v3738_v51 }
  0xb9   :  { %4215 = vrsqrt.f32 %v3737_v52  ;;  %v63_v61 = vpop.xlane.xlu1 %62  ;;  %v60_v62 = vpop.xlane.xlu0 %59 }
  0xbc   :  { %4077 = vmatmul.mubr.f32.vlgmr.msra.gmra.mrb[6].mxu0 %v2830_v4  ;;  %4107 = vmatmul.mubr.f32.vlgmr.msra.gmra.mrb[6].mxu1 %v3279_v5 }
  0xbd   :  { %4080 = vmatpush3.xpose.msra.mxu0 %v2830_v4  ;;  %4110 = vmatpush3.xpose.msra.mxu1 %v3279_v5 }
  0xbe   :  { %4081 = vmatprep.mubr.msk.f32.mxu0 %vm4273_vm0, %v4272_v0  ;;  %4084 = vmatprep.subr.mxu0 %v4272_v0 }
  0xbf   :  { %4111 = vmatprep.mubr.msk.f32.mxu1 %vm4273_vm0, %v4272_v0  ;;  %4114 = vmatprep.subr.mxu1 %v4272_v0 }
  0xc4   :  { %4082 = vmatmul.mubr.f32.vlgmr.msra.gmra.mrb[6].mxu0 %v4487_v63  ;;  %4112 = vmatmul.mubr.f32.vlgmr.msra.gmra.mrb[6].mxu1 %v4490_v1 }
  0xc5   :  { %4085 = vmatpush3.xpose.msra.mxu0 %v4487_v63  ;;  %4115 = vmatpush3.xpose.msra.mxu1 %v4490_v1 }
  0xc6   :  { %4086 = vmatprep.mubr.msk.f32.mxu0 %vm4273_vm0, %v4272_v0  ;;  %4116 = vmatprep.mubr.msk.f32.mxu1 %vm4273_vm0, %v4272_v0  ;;  %v4206_v0 = vpop.eup %4205 }
  0xc7   :  { %v4208_v22 = vpop.eup %4207 }
  0xc8   :  { %v4210_v37 = vpop.eup %4209 }
  0xc9   :  { %v4212_v38 = vpop.eup %4211 }
  0xca   :  { %v4214_v53 = vpop.eup %4213 }
  0xcb   :  { %v4216_v54 = vpop.eup %4215 }
  0xcc   :  { %4087 = vmatmul.mubr.f32.vlgmr.msra.gmra.mrb[6].mxu0 %v4487_v63  ;;  %4117 = vmatmul.mubr.f32.vlgmr.msra.gmra.mrb[6].mxu1 %v4490_v1  ;;  %v3698_v63 = vrot.slane %v63_v61, %v4560_v14  ;;  %v3694_v1 = vrot.slane %v60_v62, %v4560_v14 }
  0xce   :  { %v3732_v2 = vmul.f32 %v3698_v63, %v63_v61  ;;  %v3731_v3 = vmul.f32 %v3694_v1, %v60_v62 }
  0xd0   :  { %v3740_v4 = vmax.f32 %v3732_v2, 1e-18  ;;  %v3739_v5 = vmax.f32 %v3731_v3, 1e-18 }
  0xd2   :  { %4217 = vrsqrt.f32 %v3740_v4 }
  0xd3   :  { %4219 = vrsqrt.f32 %v3739_v5 }
  0xdc   :  { %v4218_v6 = vpop.eup %4217 }
  0xdd   :  { %v4220_v7 = vpop.eup %4219 }
 0x11b   :  { %v510_v23 = vpop.f32.mrb[0].mxu0  ;;  %v959_v24 = vpop.f32.mrb[0].mxu1 }
 0x11c   :  { %v3749_v25 = vmul.f32 %v4206_v0, %v510_v23  ;;  %v3750_v26 = vmul.f32 %v4208_v22, %v959_v24  ;;  %v3908_v27 = vpop.f32.mrb[1].mxu0  ;;  %v3938_v28 = vpop.f32.mrb[1].mxu1 }
 0x11e   :  { %3758 = vst.msk [vmem:[#allocation5] sm:$0xf] %vm3757_vm3, %v3749_v25  ;;  %3759 = vst.msk [vmem:[#allocation5 + $0x4] sm:$0xf] %vm3757_vm3, %v3750_v26 }
 0x147   :  { %v1408_v39 = vpop.f32.mrb[2].mxu0  ;;  %v1857_v40 = vpop.f32.mrb[2].mxu1 }
 0x148   :  { %v3751_v41 = vmul.f32 %v4210_v37, %v1408_v39  ;;  %v3752_v42 = vmul.f32 %v4212_v38, %v1857_v40  ;;  %v3968_v43 = vpop.f32.mrb[3].mxu0  ;;  %v3998_v44 = vpop.f32.mrb[3].mxu1 }
 0x14a   :  { %3760 = vst.msk [vmem:[#allocation5 + $0x8] sm:$0xf] %vm3757_vm3, %v3751_v41  ;;  %3761 = vst.msk [vmem:[#allocation5 + $0xc] sm:$0xf] %vm3757_vm3, %v3752_v42 }
 0x173   :  { %v2306_v55 = vpop.f32.mrb[4].mxu0  ;;  %v2755_v56 = vpop.f32.mrb[4].mxu1 }
 0x174   :  { %v3753_v57 = vmul.f32 %v4216_v54, %v2306_v55  ;;  %v3754_v58 = vmul.f32 %v4214_v53, %v2755_v56  ;;  %v4028_v59 = vpop.f32.mrb[5].mxu0  ;;  %v4058_v60 = vpop.f32.mrb[5].mxu1 }
 0x176   :  { %3762 = vst.msk [vmem:[#allocation5 + $0x10] sm:$0xf] %vm3757_vm3, %v3753_v57  ;;  %3763 = vst.msk [vmem:[#allocation5 + $0x14] sm:$0xf] %vm3757_vm3, %v3754_v58 }
 0x19f   :  { %v3204_v8 = vpop.f32.mrb[6].mxu0  ;;  %v3653_v9 = vpop.f32.mrb[6].mxu1 }
 0x1a0   :  { %v3755_v10 = vmul.f32 %v4220_v7, %v3204_v8  ;;  %v3756_v11 = vmul.f32 %v4218_v6, %v3653_v9  ;;  %v4088_v12 = vpop.f32.mrb[7].mxu0  ;;  %v4118_v13 = vpop.f32.mrb[7].mxu1 }
 0x1a2   :  { %3764 = vst.msk [vmem:[#allocation5 + $0x18] sm:$0xf] %vm3757_vm3, %v3755_v10  ;;  %3765 = vst.msk [vmem:[#allocation5 + $0x1c] sm:$0xf] %vm3757_vm3, %v3756_v11 }
 0x1a3   :  { %4254 = shalt.err (!%p4251_p12)
}
 0x1a4   :  { %s4255_s24 = scalar_lea.hbm %s4594_s1, 512 }
 0x1a5   :  { %p4256_p13 = scmp.ne.s32.totalorder %s4594_s1, %s4255_s24  ;;  %p4259_p0 = scmp.lt.u32.totalorder %s4255_s24, %s4594_s1 }
 0x1a7   :  { %p4261_p1 = pnand %p4259_p0, %p4256_p13 }
 0x1a9   :  { %4264 = shalt.err (!%p4261_p1)
}
 0x1aa   :  { %3777 = dma.vmem_to_hbm [thread:$0]  %s3772_s20, 512, %s4594_s1, [#allocation4], %s4270_s16, %s4270_s16, %s4271_s17  }
 0x1ab   :  { %4267 = dma.done.wait [#allocation4], 512  }
 0x1ac   :  { %4268 = vsyncadd [#allocation4], 4294966784 }
 0x1ad   :  { %3781 = vsyncpa [#allocation3], 1 }
 0x1ae   :  { %3782 = vsyncpa [#allocation4], 1 }

</bundles_post_ra>
